<compile_context>
chip_gen: v7x
topology: tpu7x:2x2x1
jax: 0.10.0
libtpu: 0.0.40
codegen_flags: <defaults>
</compile_context>

<pallas_src>
import jax
import jax.numpy as jnp
from jax.experimental import pallas as pl
from jax.experimental.pallas import tpu as pltpu


def gffn_kernel(x_ref, w1_ref, wd_ref, plow_ref, wo_ref, o_ref, pad_ref):
    HW, C = x_ref.shape
    Hp2, Wp2, C2 = pad_ref.shape          # (H+2, W+2, 2C)
    H, W = Hp2 - 2, Wp2 - 2

    # ---- fused up/low 1x1 convs: one bf16 MXU matmul (HW, C) @ (C, 2C) -------
    xs = x_ref[...].astype(jnp.bfloat16)
    y = jnp.dot(xs, w1_ref[...], preferred_element_type=jnp.float32)  # (HW, 2C)

    # ---- depthwise 3x3 (padding=1), both branches fused on the lane dim ------
    # Zero only the halo strips (cheap; no reliance on scratch state from other
    # grid iterations -> safe under megacore parallel sharding).  The interior
    # is fully overwritten every step.
    pad_ref[0:1, :, :] = jnp.zeros((1, Wp2, C2), jnp.float32)
    pad_ref[H + 1:H + 2, :, :] = jnp.zeros((1, Wp2, C2), jnp.float32)
    pad_ref[:, 0:1, :] = jnp.zeros((Hp2, 1, C2), jnp.float32)
    pad_ref[:, W + 1:W + 2, :] = jnp.zeros((Hp2, 1, C2), jnp.float32)
    pad_ref[1:H + 1, 1:W + 1, :] = y.reshape(H, W, C2)

    taps = wd_ref[...]                     # (9, 2C), loaded once

    def tap(k):                            # static index; broadcast over (.., W, 2C)
        return taps[k].reshape(1, 1, C2)

    # Three width-shifted windows (full padded height); height shifts are then
    # just leading-dim slices of the per-row tap sums.
    x0 = pad_ref[:, 0:W, :]                # (H+2, W, 2C)  -> column j-1
    x1 = pad_ref[:, 1:W + 1, :]            #               -> column j
    x2 = pad_ref[:, 2:W + 2, :]            #               -> column j+1
    r0 = x0 * tap(0) + x1 * tap(1) + x2 * tap(2)   # dy = 0 taps
    r1 = x0 * tap(3) + x1 * tap(4) + x2 * tap(5)   # dy = 1 taps
    r2 = x0 * tap(6) + x1 * tap(7) + x2 * tap(8)   # dy = 2 taps
    dw = (r0[0:H] + r1[1:H + 1] + r2[2:H + 2]).reshape(HW, C2)   # (HW, 2C)

    # ---- gating: up * SiLU(low) without an unaligned lane slice --------------
    # plow is a (2C, 2C) 0/1 matrix moving lanes [C, 2C) down to [0, C) (rest
    # zero); the otherwise-idle MXU does the lane move.  Lanes [C, 2C) of
    # `gated` become exactly zero (SiLU(0) = 0).
    low = jnp.dot(dw, plow_ref[...], preferred_element_type=jnp.float32)
    gated = dw * (low * jax.nn.sigmoid(low))

    # ---- output 1x1 conv: rows [C, 2C) of wo_ext are zero, dropping the unused
    # fused lanes.  bf16 operands, f32 accumulation.
    out = jnp.dot(gated.astype(jnp.bfloat16), wo_ref[...],
                  preferred_element_type=jnp.float32)            # (HW, C)
    o_ref[...] = out.astype(o_ref.dtype)


def gffn_pallas(x, w_up1, w_up_dw, w_low1, w_low_dw, w_out):
    """x: [B, H, W, C] float32.  Weights in PyTorch conventions:
       w_up1 / w_low1 / w_out: [C_out, C_in]  (1x1 conv, bias=False)
       w_up_dw / w_low_dw:     [C, 3, 3]      (depthwise 3x3, bias=False)
    """
    B, H, W, C = x.shape
    C2 = 2 * C

    # Fused 1x1 weights [C, 2C] = [up | low], bf16 for the MXU.
    w1_cat = jnp.concatenate(
        [jnp.asarray(w_up1, jnp.float32).T, jnp.asarray(w_low1, jnp.float32).T],
        axis=1).astype(jnp.bfloat16)
    # Fused depthwise taps [9, 2C] (tap-major), f32 for the VPU.
    wd_cat = jnp.concatenate(
        [jnp.asarray(w_up_dw, jnp.float32).reshape(C, 9).T,
         jnp.asarray(w_low_dw, jnp.float32).reshape(C, 9).T], axis=1)
    # Permutation moving the low half of the fused lanes into lanes [0, C).
    eye_c = jnp.eye(C, dtype=jnp.float32)
    zc = jnp.zeros((C, C), jnp.float32)
    p_low = jnp.concatenate(
        [jnp.concatenate([zc, zc], axis=1),
         jnp.concatenate([eye_c, zc], axis=1)], axis=0)          # [2C, 2C]
    # Output 1x1 weight extended to [2C, C]; rows [C, 2C) are zero.
    wo_ext = jnp.concatenate(
        [jnp.asarray(w_out, jnp.float32).T, zc], axis=0).astype(jnp.bfloat16)

    x_flat = x.reshape(B, H * W, C)

    out_flat = pl.pallas_call(
        gffn_kernel,
        out_shape=jax.ShapeDtypeStruct((B, H * W, C), jnp.float32),
        grid=(B,),
        in_specs=[
            pl.BlockSpec((None, H * W, C), lambda b: (b, 0, 0)),   # x
            pl.BlockSpec((C, C2), lambda b: (0, 0)),               # fused 1x1 w
            pl.BlockSpec((9, C2), lambda b: (0, 0)),               # fused dw taps
            pl.BlockSpec((C2, C2), lambda b: (0, 0)),              # lane permutation
            pl.BlockSpec((C2, C), lambda b: (0, 0)),               # extended out w
        ],
        out_specs=pl.BlockSpec((None, H * W, C), lambda b: (b, 0, 0)),
        scratch_shapes=[pltpu.VMEM((H + 2, W + 2, C2), jnp.float32)],  # halo pad
        compiler_params=pltpu.CompilerParams(
            dimension_semantics=("parallel",)),
    )(x_flat, w1_cat, wd_cat, p_low, wo_ext)
    return out_flat.reshape(B, H, W, C)


# ----------------------------- references -----------------------------------
def _conv1x1_f32(t, w):
    return jnp.einsum('bhwi,oi->bhwo', t, w)


def _conv1x1_bf16(t, w):
    return jnp.einsum('bhwi,oi->bhwo',
                      t.astype(jnp.bfloat16),
                      jnp.asarray(w, jnp.float32).astype(jnp.bfloat16),
                      preferred_element_type=jnp.float32)


def _dwconv3x3(t, w):  # w: [C, 3, 3], padding=1 (cross-correlation, as Conv2d)
    B, H, W, C = t.shape
    tp = jnp.pad(t, ((0, 0), (1, 1), (1, 1), (0, 0)))
    out = jnp.zeros_like(t)
    for dy in range(3):
        for dx in range(3):
            out = out + tp[:, dy:dy + H, dx:dx + W, :] * w[:, dy, dx][None, None, None, :]
    return out


def gffn_reference(x, w_up1, w_up_dw, w_low1, w_low_dw, w_out, *, bf16_matmuls):
    """Pure-JAX reference (NHWC).  bf16_matmuls=True mirrors the kernel's
    bf16 MXU operands (f32 accumulation); False is the exact f32 module."""
    conv1x1 = _conv1x1_bf16 if bf16_matmuls else _conv1x1_f32
    up = _dwconv3x3(conv1x1(x, w_up1), w_up_dw)
    low = _dwconv3x3(conv1x1(x, w_low1), w_low_dw)
    low = low * jax.nn.sigmoid(low)
    return conv1x1(up * low, w_out)


if __name__ == "__main__":
    B, H, W, C = 2, 8, 8, 32

    key = jax.random.PRNGKey(0)
    kx, k1, k2, k3, k4, k5 = jax.random.split(key, 6)

    x = jax.random.normal(kx, (B, H, W, C), jnp.float32)
    w_up1 = jax.random.normal(k1, (C, C), jnp.float32) * 0.1      # Conv2d(dim,dim,1)
    w_up_dw = jax.random.normal(k2, (C, 3, 3), jnp.float32) * 0.1  # depthwise 3x3
    w_low1 = jax.random.normal(k3, (C, C), jnp.float32) * 0.1
    w_low_dw = jax.random.normal(k4, (C, 3, 3), jnp.float32) * 0.1
    w_out = jax.random.normal(k5, (C, C), jnp.float32) * 0.1      # toOut 1x1

    out = gffn_pallas(x, w_up1, w_up_dw, w_low1, w_low_dw, w_out)
    out = jax.block_until_ready(out)
    assert out.shape == (B, H, W, C)

    # Tight check vs a reference that matches the kernel's bf16 MXU operands.
    ref_bf16 = gffn_reference(x, w_up1, w_up_dw, w_low1, w_low_dw, w_out,
                              bf16_matmuls=True)
    err_bf16 = float(jnp.max(jnp.abs(out - ref_bf16)))
    assert jnp.allclose(out, ref_bf16, atol=1e-3, rtol=2e-3), err_bf16

    # Loose sanity check vs the exact-f32 module semantics (bf16 matmuls relax
    # the achievable tolerance).
    ref_f32 = gffn_reference(x, w_up1, w_up_dw, w_low1, w_low_dw, w_out,
                             bf16_matmuls=False)
    err_f32 = float(jnp.max(jnp.abs(out - ref_f32)))
    assert jnp.allclose(out, ref_f32, atol=1e-2, rtol=1e-1), err_f32

    print("KERNEL_OK")
</pallas_src>

<mosaic_0001>
module attributes {stable_mosaic.version = 11 : i64} {
  func.func @gffn_kernel(%arg0: i32, %arg1: memref<1x64x32xf32, #tpu.memory_space<vmem>>, %arg2: memref<32x64xbf16, #tpu.memory_space<vmem>>, %arg3: memref<9x64xf32, #tpu.memory_space<vmem>>, %arg4: memref<64x64xf32, #tpu.memory_space<vmem>>, %arg5: memref<64x32xbf16, #tpu.memory_space<vmem>>, %arg6: memref<1x64x32xf32, #tpu.memory_space<vmem>>, %arg7: memref<10x10x64xf32, #tpu.memory_space<vmem>>) attributes {dimension_semantics = [#tpu.dimension_semantics<parallel>], iteration_bounds = array<i64: 2>, scalar_prefetch = 0 : i64, scratch_operands = 1 : i64, tpu.core_type = #tpu.core_type<tc>, window_params = [{transform_indices = @transform_0, window_bounds = array<i64: 1, 64, 32>}, {pipeline_mode = #tpu.pipeline_mode<synchronous>, transform_indices = @transform_1, window_bounds = array<i64: 32, 64>}, {pipeline_mode = #tpu.pipeline_mode<synchronous>, transform_indices = @transform_2, window_bounds = array<i64: 9, 64>}, {pipeline_mode = #tpu.pipeline_mode<synchronous>, transform_indices = @transform_3, window_bounds = array<i64: 64, 64>}, {pipeline_mode = #tpu.pipeline_mode<synchronous>, transform_indices = @transform_4, window_bounds = array<i64: 64, 32>}, {transform_indices = @transform_5, window_bounds = array<i64: 1, 64, 32>}]} {
    %c0 = arith.constant 0 : index
    %c0_0 = arith.constant 0 : index
    %c0_1 = arith.constant 0 : index
    %0 = vector.load %arg1[%c0, %c0_0, %c0_1] : memref<1x64x32xf32, #tpu.memory_space<vmem>>, vector<1x64x32xf32>
    %1 = vector.shape_cast %0 : vector<1x64x32xf32> to vector<64x32xf32>
    %2 = arith.truncf %1 : vector<64x32xf32> to vector<64x32xbf16>
    %c0_2 = arith.constant 0 : index
    %c0_3 = arith.constant 0 : index
    %3 = vector.load %arg2[%c0_2, %c0_3] : memref<32x64xbf16, #tpu.memory_space<vmem>>, vector<32x64xbf16>
    %cst = arith.constant dense<0.000000e+00> : vector<64x64xf32>
    %4 = tpu.matmul %2, %3, %cst {dimension_numbers = #tpu.dot_dimension_numbers<[1], [0], [0], [1], [0, 0, 1, 1], [], []>} : vector<64x32xbf16>, vector<32x64xbf16>, vector<64x64xf32> -> vector<64x64xf32>
    %cst_4 = arith.constant 0.000000e+00 : f32
    %5 = vector.broadcast %cst_4 : f32 to vector<1x10x64xf32>
    %c0_5 = arith.constant 0 : index
    %c0_6 = arith.constant 0 : index
    %c0_7 = arith.constant 0 : index
    %6 = vector.load %arg7[%c0_5, %c0_6, %c0_7] : memref<10x10x64xf32, #tpu.memory_space<vmem>>, vector<1x10x64xf32>
    tpu.vector_store %arg7[%c0_5, %c0_6, %c0_7], %5 {strides = array<i32>} : memref<10x10x64xf32, #tpu.memory_space<vmem>>, vector<1x10x64xf32>,
    %cst_8 = arith.constant 0.000000e+00 : f32
    %7 = vector.broadcast %cst_8 : f32 to vector<1x10x64xf32>
    %c9 = arith.constant 9 : index
    %c0_9 = arith.constant 0 : index
    %c0_10 = arith.constant 0 : index
    %8 = vector.load %arg7[%c9, %c0_9, %c0_10] : memref<10x10x64xf32, #tpu.memory_space<vmem>>, vector<1x10x64xf32>
    tpu.vector_store %arg7[%c9, %c0_9, %c0_10], %7 {strides = array<i32>} : memref<10x10x64xf32, #tpu.memory_space<vmem>>, vector<1x10x64xf32>,
    %cst_11 = arith.constant 0.000000e+00 : f32
    %9 = vector.broadcast %cst_11 : f32 to vector<10x1x64xf32>
    %c0_12 = arith.constant 0 : index
    %c0_13 = arith.constant 0 : index
    %c0_14 = arith.constant 0 : index
    %10 = vector.load %arg7[%c0_12, %c0_13, %c0_14] : memref<10x10x64xf32, #tpu.memory_space<vmem>>, vector<10x1x64xf32>
    tpu.vector_store %arg7[%c0_12, %c0_13, %c0_14], %9 {strides = array<i32>} : memref<10x10x64xf32, #tpu.memory_space<vmem>>, vector<10x1x64xf32>,
    %cst_15 = arith.constant 0.000000e+00 : f32
    %11 = vector.broadcast %cst_15 : f32 to vector<10x1x64xf32>
    %c0_16 = arith.constant 0 : index
    %c9_17 = arith.constant 9 : index
    %c0_18 = arith.constant 0 : index
    %12 = vector.load %arg7[%c0_16, %c9_17, %c0_18] : memref<10x10x64xf32, #tpu.memory_space<vmem>>, vector<10x1x64xf32>
    tpu.vector_store %arg7[%c0_16, %c9_17, %c0_18], %11 {strides = array<i32>} : memref<10x10x64xf32, #tpu.memory_space<vmem>>, vector<10x1x64xf32>,
    %13 = vector.shape_cast %4 : vector<64x64xf32> to vector<8x8x64xf32>
    %c1 = arith.constant 1 : index
    %c1_19 = arith.constant 1 : index
    %c0_20 = arith.constant 0 : index
    %14 = vector.load %arg7[%c1, %c1_19, %c0_20] : memref<10x10x64xf32, #tpu.memory_space<vmem>>, vector<8x8x64xf32>
    tpu.vector_store %arg7[%c1, %c1_19, %c0_20], %13 {strides = array<i32>} : memref<10x10x64xf32, #tpu.memory_space<vmem>>, vector<8x8x64xf32>,
    %c0_21 = arith.constant 0 : index
    %c0_22 = arith.constant 0 : index
    %15 = vector.load %arg3[%c0_21, %c0_22] : memref<9x64xf32, #tpu.memory_space<vmem>>, vector<9x64xf32>
    %c0_23 = arith.constant 0 : index
    %c0_24 = arith.constant 0 : index
    %c0_25 = arith.constant 0 : index
    %16 = vector.load %arg7[%c0_23, %c0_24, %c0_25] : memref<10x10x64xf32, #tpu.memory_space<vmem>>, vector<10x8x64xf32>
    %c0_26 = arith.constant 0 : index
    %c1_27 = arith.constant 1 : index
    %c0_28 = arith.constant 0 : index
    %17 = vector.load %arg7[%c0_26, %c1_27, %c0_28] : memref<10x10x64xf32, #tpu.memory_space<vmem>>, vector<10x8x64xf32>
    %c0_29 = arith.constant 0 : index
    %c2 = arith.constant 2 : index
    %c0_30 = arith.constant 0 : index
    %18 = vector.load %arg7[%c0_29, %c2, %c0_30] : memref<10x10x64xf32, #tpu.memory_space<vmem>>, vector<10x8x64xf32>
    %19 = vector.extract_strided_slice %15 {offsets = [0, 0], sizes = [1, 64], strides = [1, 1]} : vector<9x64xf32> to vector<1x64xf32>
    %20 = vector.shape_cast %19 : vector<1x64xf32> to vector<64xf32>
    %21 = vector.shape_cast %20 : vector<64xf32> to vector<1x1x64xf32>
    %22 = vector.broadcast %21 : vector<1x1x64xf32> to vector<10x8x64xf32>
    %23 = arith.mulf %16, %22 : vector<10x8x64xf32>
    %24 = vector.extract_strided_slice %15 {offsets = [1, 0], sizes = [1, 64], strides = [1, 1]} : vector<9x64xf32> to vector<1x64xf32>
    %25 = vector.shape_cast %24 : vector<1x64xf32> to vector<64xf32>
    %26 = vector.shape_cast %25 : vector<64xf32> to vector<1x1x64xf32>
    %27 = vector.broadcast %26 : vector<1x1x64xf32> to vector<10x8x64xf32>
    %28 = arith.mulf %17, %27 : vector<10x8x64xf32>
    %29 = arith.addf %23, %28 : vector<10x8x64xf32>
    %30 = vector.extract_strided_slice %15 {offsets = [2, 0], sizes = [1, 64], strides = [1, 1]} : vector<9x64xf32> to vector<1x64xf32>
    %31 = vector.shape_cast %30 : vector<1x64xf32> to vector<64xf32>
    %32 = vector.shape_cast %31 : vector<64xf32> to vector<1x1x64xf32>
    %33 = vector.broadcast %32 : vector<1x1x64xf32> to vector<10x8x64xf32>
    %34 = arith.mulf %18, %33 : vector<10x8x64xf32>
    %35 = arith.addf %29, %34 : vector<10x8x64xf32>
    %36 = vector.extract_strided_slice %15 {offsets = [3, 0], sizes = [1, 64], strides = [1, 1]} : vector<9x64xf32> to vector<1x64xf32>
    %37 = vector.shape_cast %36 : vector<1x64xf32> to vector<64xf32>
    %38 = vector.shape_cast %37 : vector<64xf32> to vector<1x1x64xf32>
    %39 = vector.broadcast %38 : vector<1x1x64xf32> to vector<10x8x64xf32>
    %40 = arith.mulf %16, %39 : vector<10x8x64xf32>
    %41 = vector.extract_strided_slice %15 {offsets = [4, 0], sizes = [1, 64], strides = [1, 1]} : vector<9x64xf32> to vector<1x64xf32>
    %42 = vector.shape_cast %41 : vector<1x64xf32> to vector<64xf32>
    %43 = vector.shape_cast %42 : vector<64xf32> to vector<1x1x64xf32>
    %44 = vector.broadcast %43 : vector<1x1x64xf32> to vector<10x8x64xf32>
    %45 = arith.mulf %17, %44 : vector<10x8x64xf32>
    %46 = arith.addf %40, %45 : vector<10x8x64xf32>
    %47 = vector.extract_strided_slice %15 {offsets = [5, 0], sizes = [1, 64], strides = [1, 1]} : vector<9x64xf32> to vector<1x64xf32>
    %48 = vector.shape_cast %47 : vector<1x64xf32> to vector<64xf32>
    %49 = vector.shape_cast %48 : vector<64xf32> to vector<1x1x64xf32>
    %50 = vector.broadcast %49 : vector<1x1x64xf32> to vector<10x8x64xf32>
    %51 = arith.mulf %18, %50 : vector<10x8x64xf32>
    %52 = arith.addf %46, %51 : vector<10x8x64xf32>
    %53 = vector.extract_strided_slice %15 {offsets = [6, 0], sizes = [1, 64], strides = [1, 1]} : vector<9x64xf32> to vector<1x64xf32>
    %54 = vector.shape_cast %53 : vector<1x64xf32> to vector<64xf32>
    %55 = vector.shape_cast %54 : vector<64xf32> to vector<1x1x64xf32>
    %56 = vector.broadcast %55 : vector<1x1x64xf32> to vector<10x8x64xf32>
    %57 = arith.mulf %16, %56 : vector<10x8x64xf32>
    %58 = vector.extract_strided_slice %15 {offsets = [7, 0], sizes = [1, 64], strides = [1, 1]} : vector<9x64xf32> to vector<1x64xf32>
    %59 = vector.shape_cast %58 : vector<1x64xf32> to vector<64xf32>
    %60 = vector.shape_cast %59 : vector<64xf32> to vector<1x1x64xf32>
    %61 = vector.broadcast %60 : vector<1x1x64xf32> to vector<10x8x64xf32>
    %62 = arith.mulf %17, %61 : vector<10x8x64xf32>
    %63 = arith.addf %57, %62 : vector<10x8x64xf32>
    %64 = vector.extract_strided_slice %15 {offsets = [8, 0], sizes = [1, 64], strides = [1, 1]} : vector<9x64xf32> to vector<1x64xf32>
    %65 = vector.shape_cast %64 : vector<1x64xf32> to vector<64xf32>
    %66 = vector.shape_cast %65 : vector<64xf32> to vector<1x1x64xf32>
    %67 = vector.broadcast %66 : vector<1x1x64xf32> to vector<10x8x64xf32>
    %68 = arith.mulf %18, %67 : vector<10x8x64xf32>
    %69 = arith.addf %63, %68 : vector<10x8x64xf32>
    %70 = vector.extract_strided_slice %35 {offsets = [0, 0, 0], sizes = [8, 8, 64], strides = [1, 1, 1]} : vector<10x8x64xf32> to vector<8x8x64xf32>
    %71 = vector.extract_strided_slice %52 {offsets = [1, 0, 0], sizes = [8, 8, 64], strides = [1, 1, 1]} : vector<10x8x64xf32> to vector<8x8x64xf32>
    %72 = arith.addf %70, %71 : vector<8x8x64xf32>
    %73 = vector.extract_strided_slice %69 {offsets = [2, 0, 0], sizes = [8, 8, 64], strides = [1, 1, 1]} : vector<10x8x64xf32> to vector<8x8x64xf32>
    %74 = arith.addf %72, %73 : vector<8x8x64xf32>
    %75 = vector.shape_cast %74 : vector<8x8x64xf32> to vector<64x64xf32>
    %c0_31 = arith.constant 0 : index
    %c0_32 = arith.constant 0 : index
    %76 = vector.load %arg4[%c0_31, %c0_32] : memref<64x64xf32, #tpu.memory_space<vmem>>, vector<64x64xf32>
    %cst_33 = arith.constant dense<0.000000e+00> : vector<64x64xf32>
    %77 = tpu.matmul %75, %76, %cst_33 {dimension_numbers = #tpu.dot_dimension_numbers<[1], [0], [0], [1], [0, 0, 1, 1], [], []>} : vector<64x64xf32>, vector<64x64xf32>, vector<64x64xf32> -> vector<64x64xf32>
    %78 = arith.negf %77 : vector<64x64xf32>
    %79 = math.exp %78 : vector<64x64xf32>
    %cst_34 = arith.constant 1.000000e+00 : f32
    %80 = vector.broadcast %cst_34 : f32 to vector<64x64xf32>
    %81 = arith.addf %80, %79 : vector<64x64xf32>
    %82 = arith.divf %80, %81 : vector<64x64xf32>
    %83 = arith.mulf %77, %82 : vector<64x64xf32>
    %84 = arith.mulf %75, %83 : vector<64x64xf32>
    %85 = arith.truncf %84 : vector<64x64xf32> to vector<64x64xbf16>
    %c0_35 = arith.constant 0 : index
    %c0_36 = arith.constant 0 : index
    %86 = vector.load %arg5[%c0_35, %c0_36] : memref<64x32xbf16, #tpu.memory_space<vmem>>, vector<64x32xbf16>
    %cst_37 = arith.constant dense<0.000000e+00> : vector<64x32xf32>
    %87 = tpu.matmul %85, %86, %cst_37 {dimension_numbers = #tpu.dot_dimension_numbers<[1], [0], [0], [1], [0, 0, 1, 1], [], []>} : vector<64x64xbf16>, vector<64x32xbf16>, vector<64x32xf32> -> vector<64x32xf32>
    %c0_38 = arith.constant 0 : index
    %c0_39 = arith.constant 0 : index
    %c0_40 = arith.constant 0 : index
    %88 = vector.load %arg6[%c0_38, %c0_39, %c0_40] : memref<1x64x32xf32, #tpu.memory_space<vmem>>, vector<1x64x32xf32>
    %89 = vector.shape_cast %88 : vector<1x64x32xf32> to vector<64x32xf32>
    %90 = vector.shape_cast %87 : vector<64x32xf32> to vector<1x64x32xf32>
    tpu.vector_store %arg6[%c0_38, %c0_39, %c0_40], %90 {strides = array<i32>} : memref<1x64x32xf32, #tpu.memory_space<vmem>>, vector<1x64x32xf32>,
    return
  }
  func.func @transform_0(%arg0: i32) -> (i32, i32, i32) {
    %c0_i32 = arith.constant 0 : i32
    %c0_i32_0 = arith.constant 0 : i32
    %c0_i32_1 = arith.constant 0 : i32
    return %arg0, %c0_i32, %c0_i32_0 : i32, i32, i32
  }
  func.func @transform_1(%arg0: i32) -> (i32, i32) {
    %c0_i32 = arith.constant 0 : i32
    %c0_i32_0 = arith.constant 0 : i32
    %c0_i32_1 = arith.constant 0 : i32
    return %c0_i32, %c0_i32_0 : i32, i32
  }
  func.func @transform_2(%arg0: i32) -> (i32, i32) {
    %c0_i32 = arith.constant 0 : i32
    %c0_i32_0 = arith.constant 0 : i32
    %c0_i32_1 = arith.constant 0 : i32
    return %c0_i32, %c0_i32_0 : i32, i32
  }
  func.func @transform_3(%arg0: i32) -> (i32, i32) {
    %c0_i32 = arith.constant 0 : i32
    %c0_i32_0 = arith.constant 0 : i32
    %c0_i32_1 = arith.constant 0 : i32
    return %c0_i32, %c0_i32_0 : i32, i32
  }
  func.func @transform_4(%arg0: i32) -> (i32, i32) {
    %c0_i32 = arith.constant 0 : i32
    %c0_i32_0 = arith.constant 0 : i32
    %c0_i32_1 = arith.constant 0 : i32
    return %c0_i32, %c0_i32_0 : i32, i32
  }
  func.func @transform_5(%arg0: i32) -> (i32, i32, i32) {
    %c0_i32 = arith.constant 0 : i32
    %c0_i32_0 = arith.constant 0 : i32
    %c0_i32_1 = arith.constant 0 : i32
    return %arg0, %c0_i32, %c0_i32_0 : i32, i32, i32
  }
}

</mosaic_0001>

<bundles_post_ra>
// kernel: tpu_custom_call.1
= control target key start
LH: loop header
LB: loop body
LE: loop exit
PB: predicated region body
PF: predicated region fallthrough
CT: control target
= control target key end

     0   :  { %s1182_s18 = smov 0   ;;  %s1448_s0 = inlined_call_operand.vmem [shape: f32[2,64,32], index: 0, kind: input, shape index: {}]   ;;  %s1449_s1 = inlined_call_operand.vmem [shape: bf16[32,64], index: 1, kind: input, shape index: {}]   ;;  %s1450_s2 = inlined_call_operand.vmem [shape: f32[9,64], index: 2, kind: input, shape index: {}]   ;;  %s1451_s3 = inlined_call_operand.vmem [shape: f32[64,64], index: 3, kind: input, shape index: {}]   ;;  %s1452_s4 = inlined_call_operand.vmem [shape: bf16[64,32], index: 4, kind: input, shape index: {}]   ;;  %s1453_s5 = inlined_call_operand.vmem [shape: f32[2,64,32], index: 5, kind: output, shape index: {}]  }
   0x1 LB: > { %s950_s19 = sadd.s32 4294967295, %s1149_s18   ;;  %p954_p0 = scmp.ge.s32.totalorder %s1149_s18, 1  ;;  %s1149_s18 = sphi %s1182_s18, %s15_s18  }
   0x2   : > { %p187_p1 = scmp.lt.s32.totalorder %s1149_s18, 3 }
   0x4   : > { %p188_p2 = pnand %p954_p0, %p187_p1 }
   0x5   : > { %v1105_v0 = vld [vmem:[%s1449_s1] sm:$0xff] (!%p188_p2)   ;;  %p215_p3 = scmp.lt.s32.totalorder (!%p188_p2), %s950_s19, 1  ;;  %v1106_v1 = vld [vmem:[%s1449_s1 + $0x8] sm:$0xff] (!%p188_p2)   ;;  %vm254_vm0 = vcmask (!%p188_p2), 261120   ;;  %vm332_vm1 = vcmask (!%p188_p2), 523264   ;;  %vm339_vm2 = vcmask (!%p188_p2), 516096   ;;  %v401_v27 = vlaneseq (!%p188_p2) }
   0x6   : > { %191 = sbr.rel (%p188_p2) target bundleno = 740 (0x2e4), region = 40  ;;  %1024 = vmatprep.subr.bf16.mxu0 (!%p188_p2), %v1105_v0  ;;  %v1151_v14 = vmov (!%p188_p2), 0.0   ;;  %vm334_vm3 = vcmask (!%p188_p2), 517120   ;;  %v573_v15 = vld [vmem:[%s1451_s3] sm:$0xff] (!%p188_p2)  ;;  %v574_v16 = vld [vmem:[%s1451_s3 + $0x8] sm:$0xff] (!%p188_p2)  ;;  %v575_v18 = vld [vmem:[%s1451_s3 + $0x10] sm:$0xff] (!%p188_p2) }
   0x7   : > { %1025 = vmatpush3.bf16.msra.mxu0 (!%p188_p2), %v1105_v0  ;;  %333 = vst.msk [vmem:[#allocation2] sm:$0xff] (!%p188_p2), %vm332_vm1, %v1151_v14  ;;  %337 = vst.msk [vmem:[#allocation2 + $0x90] sm:$0xff] (!%p188_p2), %vm332_vm1, %v1151_v14  ;;  %v1080_v17 = vpack.c.bf16 (!%p188_p2), %v574_v16, %v573_v15  ;;  %v576_v19 = vld [vmem:[%s1451_s3 + $0x18] sm:$0xff] (!%p188_p2)  ;;  %v577_v21 = vld [vmem:[%s1451_s3 + $0x20] sm:$0xff] (!%p188_p2)  ;;  %v402_v28 = vshrl.u32 (!%p188_p2), %v401_v27, 7 }
   0x8   : > { %1026 = vmatprep.subr.bf16.mxu0 (!%p188_p2), %v1106_v1  ;;  %341 = vst.msk [vmem:[#allocation2 + $0x10] sm:$0x1] (!%p188_p2), %vm339_vm2, %v1151_v14  ;;  %342 = vst.msk [vmem:[#allocation2 + $0x20] sm:$0x1] (!%p188_p2), %vm339_vm2, %v1151_v14  ;;  %v1084_v20 = vpack.c.bf16 (!%p188_p2), %v576_v19, %v575_v18  ;;  %v578_v22 = vld [vmem:[%s1451_s3 + $0x28] sm:$0xff] (!%p188_p2)  ;;  %v579_v24 = vld [vmem:[%s1451_s3 + $0x30] sm:$0xff] (!%p188_p2) }
   0x9   : > { %351 = vst.msk [vmem:[#allocation2 + $0x19] sm:$0x1] (!%p188_p2), %vm339_vm2, %v1151_v14  ;;  %352 = vst.msk [vmem:[#allocation2 + $0x29] sm:$0x1] (!%p188_p2), %vm339_vm2, %v1151_v14  ;;  %1081 = vmatprep.subr.bf16.mxu1 (!%p188_p2), %v1080_v17  ;;  %v1088_v23 = vpack.c.bf16 (!%p188_p2), %v578_v22, %v577_v21  ;;  %v580_v25 = vld [vmem:[%s1451_s3 + $0x38] sm:$0xff] (!%p188_p2)  ;;  %v403_v29 = vsub.s32 (!%p188_p2), 0, %v402_v28 }
   0xa   : > { %343 = vst.msk [vmem:[#allocation2 + $0x30] sm:$0x1] (!%p188_p2), %vm339_vm2, %v1151_v14  ;;  %344 = vst.msk [vmem:[#allocation2 + $0x40] sm:$0x1] (!%p188_p2), %vm339_vm2, %v1151_v14  ;;  %1083 = vmatpush3.bf16.msra.mxu1 (!%p188_p2), %v1080_v17  ;;  %v1092_v26 = vpack.c.bf16 (!%p188_p2), %v580_v25, %v579_v24  ;;  %v415_v30 = vsub.s32 (!%p188_p2), 1, %v402_v28  ;;  %v369_v31 = vld [vmem:[%s1450_s2] sm:$0xff] (!%p188_p2) }
   0xb   : > { %1027 = vmatpush3.bf16.msra.mxu0 (!%p188_p2), %v1106_v1  ;;  %345 = vst.msk [vmem:[#allocation2 + $0x50] sm:$0x1] (!%p188_p2), %vm339_vm2, %v1151_v14  ;;  %346 = vst.msk [vmem:[#allocation2 + $0x60] sm:$0x1] (!%p188_p2), %vm339_vm2, %v1151_v14  ;;  %1085 = vmatprep.subr.bf16.mxu1 (!%p188_p2), %v1084_v20  ;;  %v1259_v32 = vrot.slane (!%p188_p2), %v369_v31, %v403_v29  ;;  %v435_v36 = vsub.s32 (!%p188_p2), 2, %v402_v28  ;;  %v507_v37 = vsub.s32 (!%p188_p2), 6, %v402_v28 }
   0xc   : > { %347 = vst.msk [vmem:[#allocation2 + $0x70] sm:$0x1] (!%p188_p2), %vm339_vm2, %v1151_v14  ;;  %348 = vst.msk [vmem:[#allocation2 + $0x80] sm:$0x1] (!%p188_p2), %vm339_vm2, %v1151_v14  ;;  %v1261_v33 = vrot.slane (!%p188_p2), %v369_v31, %v415_v30  ;;  %v519_v38 = vsub.s32 (!%p188_p2), 7, %v402_v28  ;;  %v455_v48 = vsub.s32 (!%p188_p2), 3, %v402_v28 }
   0xd   : > { %s1455_s19 = smov (!%p215_p3, %s950_s19), 1  ;;  %353 = vst.msk [vmem:[#allocation2 + $0x39] sm:$0x1] %vm339_vm2, %v1151_v14  ;;  %354 = vst.msk [vmem:[#allocation2 + $0x49] sm:$0x1] %vm339_vm2, %v1151_v14  ;;  %v1267_v47 = vrot.slane %v369_v31, %v435_v36  ;;  %v1269_v49 = vrot.slane %v369_v31, %v507_v37  ;;  %v467_v52 = vsub.s32 4, %v402_v28 }
   0xe   : > { %s992_s24 = sshll.u32 %s1455_s19, 6  ;;  %355 = vst.msk [vmem:[#allocation2 + $0x59] sm:$0x1] %vm339_vm2, %v1151_v14  ;;  %356 = vst.msk [vmem:[#allocation2 + $0x69] sm:$0x1] %vm339_vm2, %v1151_v14  ;;  %1087 = vmatpush3.bf16.msra.mxu1 %v1084_v20  ;;  %v1271_v50 = vrot.slane %v369_v31, %v519_v38  ;;  %v487_v53 = vsub.s32 5, %v402_v28  ;;  %v1283_v59 = vrot.slane %v369_v31, %v455_v48 }
   0xf   : > { %s219_s27 = scalar_lea.vmem %s1448_s0, %s992_s24  ;;  %357 = vst.msk [vmem:[#allocation2 + $0x79] sm:$0x1] %vm339_vm2, %v1151_v14  ;;  %358 = vst.msk [vmem:[#allocation2 + $0x89] sm:$0x1] %vm339_vm2, %v1151_v14  ;;  %1089 = vmatprep.subr.bf16.mxu1 %v1088_v23  ;;  %v1281_v58 = vld [vmem:[%s1450_s2 + $0x8] ss:$0 sm:$0xff]  ;;  %v1285_v61 = vrot.slane %v369_v31, %v467_v52  ;;  %s224_s11 = scalar_lea.vmem %s1453_s5, %s992_s24 }
  0x10   : > { %v226_v2 = vld [vmem:[%s219_s27] sm:$0xff]  ;;  %v227_v3 = vld [vmem:[%s219_s27 + $0x8] sm:$0xff]  ;;  %v228_v4 = vld [vmem:[%s219_s27 + $0x10] sm:$0xff]  ;;  %335 = vst.msk [vmem:[#allocation2 + $0x8] sm:$0x3] %vm334_vm3, %v1151_v14  ;;  %v1287_v62 = vrot.slane %v369_v31, %v487_v53 }
  0x11   : > { %v234_v5 = vpack.c.bf16 %v227_v3, %v226_v2  ;;  %v229_v6 = vld [vmem:[%s219_s27 + $0x18] sm:$0xff]  ;;  %v230_v7 = vld [vmem:[%s219_s27 + $0x20] sm:$0xff]  ;;  %v231_v8 = vld [vmem:[%s219_s27 + $0x28] sm:$0xff]  ;;  %338 = vst.msk [vmem:[#allocation2 + $0x98] sm:$0x3] %vm334_vm3, %v1151_v14 }
  0x12   : > { %v235_v9 = vpack.c.bf16 %v229_v6, %v228_v4  ;;  %v236_v10 = vpack.c.bf16 %v231_v8, %v230_v7  ;;  %v232_v11 = vld [vmem:[%s219_s27 + $0x30] sm:$0xff]  ;;  %v233_v12 = vld [vmem:[%s219_s27 + $0x38] sm:$0xff]  ;;  %340 = vst.msk [vmem:[#allocation2] sm:$0x1] %vm339_vm2, %v1151_v14  ;;  %349 = vst.msk [vmem:[#allocation2 + $0x90] sm:$0x1] %vm339_vm2, %v1151_v14  ;;  %1091 = vmatpush3.bf16.msra.mxu1 %v1088_v23 }
  0x13   : > { %1028 = vmatprep.mubr.msk.bf16.mxu0 %vm254_vm0, %v234_v5  ;;  %v237_v13 = vpack.c.bf16 %v233_v12, %v232_v11  ;;  %350 = vst.msk [vmem:[#allocation2 + $0x9] sm:$0x1] %vm339_vm2, %v1151_v14  ;;  %359 = vst.msk [vmem:[#allocation2 + $0x99] sm:$0x1] %vm339_vm2, %v1151_v14  ;;  %1093 = vmatprep.subr.bf16.mxu1 %v1092_v26 }
  0x14   : > { %1029 = vmatmul.mubr.msk.bf16.vlgmr.msra.gmra.mrb[0].mxu0 %vm254_vm0, %v235_v9 }
  0x15   : > { %1032 = vmatprep.mubr.msk.bf16.mxu0 %vm254_vm0, %v236_v10 }
  0x16   : > { %1095 = vmatpush3.bf16.msra.mxu1 %v1092_v26 }
  0x17   : > { %v381_v35 = vld [vmem:[#allocation2 + $0x1] sm:$0xff] }
  0x18   : > { %v417_v41 = vmul.f32 %v1261_v33, %v381_v35  ;;  %v390_v45 = vld [vmem:[#allocation2 + $0x91] sm:$0xff] }
  0x19   : > { %v371_v34 = vld [vmem:[#allocation2] sm:$0xff]  ;;  %v380_v44 = vld [vmem:[#allocation2 + $0x90] sm:$0xff]  ;;  %v528_v57 = vmul.f32 %v1271_v50, %v390_v45 }
  0x1a   : > { %v405_v40 = vmul.f32 %v1259_v32, %v371_v34  ;;  %v391_v43 = vld [vmem:[#allocation2 + $0x2] sm:$0xff]  ;;  %v516_v56 = vmul.f32 %v1269_v49, %v380_v44  ;;  %v400_v60 = vld [vmem:[#allocation2 + $0x92] sm:$0xff] }
  0x1b   : > { %v437_v55 = vmul.f32 %v1267_v47, %v391_v43  ;;  %v1302_v12 = vmul.f32 %v1281_v58, %v400_v60 }
  0x1c   : > { %1033 = vmatmul.mubr.msk.bf16.gmra.mrb[4].mxu0 %vm254_vm0, %v237_v13  ;;  %v425_v54 = vadd.f32 %v417_v41, %v405_v40  ;;  %v1293_v4 = vadd.f32 %v528_v57, %v516_v56 }
  0x1e   : > { %v445_v0 = vadd.f32 %v437_v55, %v425_v54 }
  0xe7   : > { %v1030_v39 = vpop.f32.mrb[0].mxu0 }
  0xe8   : > { %363 = vst.msk [vmem:[#allocation2 + $0x31] sm:$0xff] %vm332_vm1, %v1030_v39  ;;  %v301_v42 = vpop.f32.mrb[1].mxu0 }
  0xe9   : > { %361 = vst.msk [vmem:[#allocation2 + $0x11] sm:$0xff] %vm332_vm1, %v301_v42  ;;  %v1031_v46 = vpop.f32.mrb[2].mxu0 }
  0xea   : > { %364 = vst.msk [vmem:[#allocation2 + $0x41] sm:$0xff] %vm332_vm1, %v1031_v46  ;;  %v304_v51 = vpop.f32.mrb[3].mxu0 }
  0xeb   : > { %362 = vst.msk [vmem:[#allocation2 + $0x21] sm:$0xff] %vm332_vm1, %v304_v51 }
  0xef   : > { %v1034_v63 = vpop.f32.mrb[4].mxu0  ;;  %v374_v1 = vld [vmem:[#allocation2 + $0x30] sm:$0xff] }
  0xf0   : > { %v1289_v2 = vld [vmem:[#allocation2 + $0x31] sm:$0xff]  ;;  %367 = vst.msk [vmem:[#allocation2 + $0x71] sm:$0xff] %vm332_vm1, %v1034_v63  ;;  %v317_v5 = vpop.f32.mrb[5].mxu0  ;;  %v510_v9 = vmul.f32 %v1269_v49, %v374_v1  ;;  %v459_v17 = vmul.f32 %v1283_v59, %v374_v1 }
  0xf1   : > { %v1291_v3 = vld [vmem:[#allocation2 + $0x32] sm:$0xff]  ;;  %v522_v10 = vmul.f32 %v1271_v50, %v1289_v2  ;;  %365 = vst.msk [vmem:[#allocation2 + $0x51] sm:$0xff] %vm332_vm1, %v317_v5  ;;  %v1035_v13 = vpop.f32.mrb[6].mxu0  ;;  %v471_v25 = vmul.f32 %v1285_v61, %v1289_v2  ;;  %v375_v36 = vld [vmem:[#allocation2 + $0x40] sm:$0xff] }
  0xf2   : > { %v372_v6 = vld [vmem:[#allocation2 + $0x10] sm:$0xff]  ;;  %v542_v11 = vmul.f32 %v1281_v58, %v1291_v3  ;;  %368 = vst.msk [vmem:[#allocation2 + $0x81] sm:$0xff] %vm332_vm1, %v1035_v13  ;;  %v320_v18 = vpop.f32.mrb[7].mxu0  ;;  %v373_v19 = vld [vmem:[#allocation2 + $0x20] sm:$0xff]  ;;  %v491_v52 = vmul.f32 %v1287_v62, %v1291_v3  ;;  %v511_v53 = vmul.f32 %v1269_v49, %v375_v36 }
  0xf3   : > { %v382_v7 = vld [vmem:[#allocation2 + $0x11] sm:$0xff]  ;;  %v406_v14 = vmul.f32 %v1259_v32, %v372_v6  ;;  %v457_v16 = vmul.f32 %v1283_v59, %v372_v6  ;;  %v383_v20 = vld [vmem:[#allocation2 + $0x21] sm:$0xff]  ;;  %366 = vst.msk [vmem:[#allocation2 + $0x61] sm:$0xff] %vm332_vm1, %v320_v18  ;;  %v407_v26 = vmul.f32 %v1259_v32, %v373_v19  ;;  %v458_v28 = vmul.f32 %v1283_v59, %v373_v19 }
  0xf4   : > { %v392_v8 = vld [vmem:[#allocation2 + $0x12] sm:$0xff]  ;;  %v418_v15 = vmul.f32 %v1261_v33, %v382_v7  ;;  %v393_v21 = vld [vmem:[#allocation2 + $0x22] sm:$0xff]  ;;  %v469_v23 = vmul.f32 %v1285_v61, %v382_v7  ;;  %v419_v27 = vmul.f32 %v1261_v33, %v383_v20  ;;  %v530_v29 = vadd.f32 %v522_v10, %v510_v9 }
  0xf5   : > { %v438_v22 = vmul.f32 %v1267_v47, %v392_v8  ;;  %v489_v24 = vmul.f32 %v1287_v62, %v392_v8  ;;  %v439_v30 = vmul.f32 %v1267_v47, %v393_v21  ;;  %v470_v31 = vmul.f32 %v1285_v61, %v383_v20  ;;  %v385_v41 = vld [vmem:[#allocation2 + $0x41] sm:$0xff] }
  0xf6   : > { %v477_v34 = vadd.f32 %v469_v23, %v457_v16  ;;  %v509_v35 = vmul.f32 %v1269_v49, %v373_v19  ;;  %v490_v37 = vmul.f32 %v1287_v62, %v393_v21  ;;  %v521_v38 = vmul.f32 %v1271_v50, %v383_v20  ;;  %v395_v51 = vld [vmem:[#allocation2 + $0x42] sm:$0xff] }
  0xf7   : > { %v541_v39 = vmul.f32 %v1281_v58, %v393_v21  ;;  %v426_v40 = vadd.f32 %v418_v15, %v406_v14  ;;  %v478_v43 = vadd.f32 %v470_v31, %v458_v28  ;;  %v427_v44 = vadd.f32 %v419_v27, %v407_v26 }
  0xf8   : > { %v497_v42 = vadd.f32 %v489_v24, %v477_v34  ;;  %v479_v45 = vadd.f32 %v471_v25, %v459_v17  ;;  %v529_v46 = vadd.f32 %v521_v38, %v509_v35  ;;  %v523_v57 = vmul.f32 %v1271_v50, %v385_v41  ;;  %v376_v10 = vld [vmem:[#allocation2 + $0x50] sm:$0xff] }
  0xf9   : > { %v446_v48 = vadd.f32 %v438_v22, %v426_v40  ;;  %v498_v55 = vadd.f32 %v490_v37, %v478_v43  ;;  %v447_v56 = vadd.f32 %v439_v30, %v427_v44  ;;  %v550_v63 = vadd.f32 %v542_v11, %v530_v29  ;;  %v386_v13 = vld [vmem:[#allocation2 + $0x51] sm:$0xff] }
  0xfa   : > { %v557_v54 = vadd.f32 %v497_v42, %v445_v0  ;;  %v549_v60 = vadd.f32 %v541_v39, %v529_v46  ;;  %v499_v5 = vadd.f32 %v491_v52, %v479_v45  ;;  %v408_v6 = vmul.f32 %v1259_v32, %v374_v1  ;;  %v396_v16 = vld [vmem:[#allocation2 + $0x52] sm:$0xff]  ;;  %v377_v24 = vld [vmem:[#allocation2 + $0x60] sm:$0xff] }
  0xfb   : > { %v558_v7 = vadd.f32 %v498_v55, %v446_v48  ;;  %v531_v8 = vadd.f32 %v523_v57, %v511_v53  ;;  %v543_v9 = vmul.f32 %v1281_v58, %v395_v51  ;;  %v420_v14 = vmul.f32 %v1261_v33, %v1289_v2  ;;  %v387_v27 = vld [vmem:[#allocation2 + $0x61] sm:$0xff]  ;;  %v378_v46 = vld [vmem:[#allocation2 + $0x70] sm:$0xff] }
  0xfc   : > { %v1333_v15 = vadd.f32 %v557_v54, %v549_v60  ;;  %v559_v0 = vadd.f32 %v499_v5, %v447_v56  ;;  %v460_v17 = vmul.f32 %v1283_v59, %v375_v36  ;;  %v472_v11 = vmul.f32 %v1285_v61, %v385_v41  ;;  %v397_v34 = vld [vmem:[#allocation2 + $0x62] sm:$0xff]  ;;  %v388_v48 = vld [vmem:[#allocation2 + $0x71] sm:$0xff] }
  0xfd   : > { %v1337_v18 = vadd.f32 %v558_v7, %v550_v63  ;;  %v551_v1 = vadd.f32 %v543_v9, %v531_v8  ;;  %v428_v19 = vadd.f32 %v420_v14, %v408_v6  ;;  %v440_v20 = vmul.f32 %v1267_v47, %v1291_v3  ;;  %v398_v56 = vld [vmem:[#allocation2 + $0x72] sm:$0xff] }
  0xfe   : > { %1052 = vmatprep.mubr.msk.f32.mxu1 %vm332_vm1, %v1333_v15  ;;  %v480_v21 = vadd.f32 %v472_v11, %v460_v17  ;;  %v492_v2 = vmul.f32 %v1287_v62, %v395_v51  ;;  %v512_v22 = vmul.f32 %v1269_v49, %v376_v10  ;;  %v524_v23 = vmul.f32 %v1271_v50, %v386_v13  ;;  %v379_v17 = vld [vmem:[#allocation2 + $0x80] sm:$0xff] }
  0xff   : > { %1053 = vmatmul.mubr.msk.f32.vlgmr.msra.gmra.mrb[0].mxu1 %vm332_vm1, %v1337_v18  ;;  %v1348_v25 = vadd.f32 %v559_v0, %v551_v1  ;;  %v544_v26 = vmul.f32 %v1281_v58, %v396_v16  ;;  %v409_v3 = vmul.f32 %v1259_v32, %v375_v36  ;;  %v421_v28 = vmul.f32 %v1261_v33, %v385_v41  ;;  %v389_v11 = vld [vmem:[#allocation2 + $0x81] sm:$0xff] }
 0x100   : > { %v448_v29 = vadd.f32 %v440_v20, %v428_v19  ;;  %v500_v30 = vadd.f32 %v492_v2, %v480_v21  ;;  %v532_v31 = vadd.f32 %v524_v23, %v512_v22  ;;  %v461_v35 = vmul.f32 %v1283_v59, %v376_v10  ;;  %v399_v23 = vld [vmem:[#allocation2 + $0x82] sm:$0xff] }
 0x101   : > { %1055 = vmatprep.mubr.msk.f32.mxu1 %vm332_vm1, %v1348_v25  ;;  %v429_v37 = vadd.f32 %v421_v28, %v409_v3  ;;  %v441_v38 = vmul.f32 %v1267_v47, %v395_v51  ;;  %v473_v39 = vmul.f32 %v1285_v61, %v386_v13  ;;  %v513_v40 = vmul.f32 %v1269_v49, %v377_v24 }
 0x102   : > { %v552_v42 = vadd.f32 %v544_v26, %v532_v31  ;;  %v560_v36 = vadd.f32 %v500_v30, %v448_v29  ;;  %v493_v41 = vmul.f32 %v1287_v62, %v396_v16  ;;  %v525_v43 = vmul.f32 %v1271_v50, %v387_v27 }
 0x103   : > { %v481_v44 = vadd.f32 %v473_v39, %v461_v35  ;;  %v545_v45 = vmul.f32 %v1281_v58, %v397_v34  ;;  %v410_v52 = vmul.f32 %v1259_v32, %v376_v10  ;;  %v422_v53 = vmul.f32 %v1261_v33, %v386_v13 }
 0x104   : > { %v1364_v51 = vadd.f32 %v560_v36, %v552_v42  ;;  %v449_v54 = vadd.f32 %v441_v38, %v429_v37  ;;  %v533_v55 = vadd.f32 %v525_v43, %v513_v40  ;;  %v462_v57 = vmul.f32 %v1283_v59, %v377_v24 }
 0x105   : > { %v501_v60 = vadd.f32 %v493_v41, %v481_v44  ;;  %v430_v63 = vadd.f32 %v422_v53, %v410_v52  ;;  %v442_v5 = vmul.f32 %v1267_v47, %v396_v16  ;;  %v474_v6 = vmul.f32 %v1285_v61, %v387_v27  ;;  %v1108_v52 = vld [vmem:[%s1452_s4 + $0x8] sm:$0xff]  }
 0x106   : > { %1056 = vmatmul.mubr.msk.f32.gmra.mrb[2].mxu1 %vm332_vm1, %v1364_v51  ;;  %v553_v7 = vadd.f32 %v545_v45, %v533_v55  ;;  %v494_v8 = vmul.f32 %v1287_v62, %v397_v34  ;;  %v514_v9 = vmul.f32 %v1269_v49, %v378_v46  ;;  %v526_v10 = vmul.f32 %v1271_v50, %v388_v48 }
 0x107   : > { %v561_v13 = vadd.f32 %v501_v60, %v449_v54  ;;  %v482_v14 = vadd.f32 %v474_v6, %v462_v57  ;;  %v546_v0 = vmul.f32 %v1281_v58, %v398_v56  ;;  %v411_v16 = vmul.f32 %v1259_v32, %v377_v24 }
 0x108   : > { %v450_v1 = vadd.f32 %v442_v5, %v430_v63  ;;  %v534_v19 = vadd.f32 %v526_v10, %v514_v9  ;;  %v423_v20 = vmul.f32 %v1261_v33, %v387_v27  ;;  %v463_v21 = vmul.f32 %v1283_v59, %v378_v46 }
 0x109   : > { %v1378_v2 = vadd.f32 %v561_v13, %v553_v7  ;;  %v502_v22 = vadd.f32 %v494_v8, %v482_v14  ;;  %v443_v26 = vmul.f32 %v1267_v47, %v397_v34  ;;  %v475_v3 = vmul.f32 %v1285_v61, %v388_v48 }
 0x10a   : > { %v431_v28 = vadd.f32 %v423_v20, %v411_v16  ;;  %v495_v29 = vmul.f32 %v1287_v62, %v398_v56  ;;  %v515_v30 = vmul.f32 %v1269_v49, %v379_v17  ;;  %v527_v24 = vmul.f32 %v1271_v50, %v389_v11 }
 0x10b   : > { %1058 = vmatprep.mubr.msk.f32.mxu1 %vm332_vm1, %v1378_v2  ;;  %v554_v27 = vadd.f32 %v546_v0, %v534_v19  ;;  %v562_v31 = vadd.f32 %v502_v22, %v450_v1  ;;  %v483_v35 = vadd.f32 %v475_v3, %v463_v21  ;;  %v412_v37 = vmul.f32 %v1259_v32, %v378_v46 }
 0x10c   : > { %v451_v38 = vadd.f32 %v443_v26, %v431_v28  ;;  %v535_v39 = vadd.f32 %v527_v24, %v515_v30  ;;  %v547_v34 = vmul.f32 %v1281_v58, %v399_v23  ;;  %v424_v40 = vmul.f32 %v1261_v33, %v388_v48 }
 0x10d   : > { %v1390_v42 = vadd.f32 %v562_v31, %v554_v27  ;;  %v503_v36 = vadd.f32 %v495_v29, %v483_v35  ;;  %v464_v49 = vmul.f32 %v1283_v59, %v379_v17  ;;  %v476_v50 = vmul.f32 %v1285_v61, %v389_v11 }
 0x10e   : > { %v432_v41 = vadd.f32 %v424_v40, %v412_v37  ;;  %v444_v43 = vmul.f32 %v1267_v47, %v398_v56  ;;  %v555_v32 = vadd.f32 %v547_v34, %v535_v39  ;;  %v496_v58 = vmul.f32 %v1287_v62, %v399_v23  ;;  %v1107_v62 = vld [vmem:[%s1452_s4] sm:$0xff]  }
 0x10f   : > { %1059 = vmatmul.mubr.msk.f32.gmra.mrb[4].mxu1 %vm332_vm1, %v1390_v42  ;;  %v563_v44 = vadd.f32 %v503_v36, %v451_v38  ;;  %v484_v45 = vadd.f32 %v476_v50, %v464_v49  ;;  %v556_v59 = vadd.f32 %v1302_v12, %v1293_v4  ;;  %1064 = vmatprep.subr.bf16.mxu0 %v1107_v62  ;;  %v1109_v4 = vld [vmem:[%s1452_s4 + $0x10] sm:$0xff]   ;;  %v1110_v12 = vld [vmem:[%s1452_s4 + $0x18] sm:$0xff]  }
 0x110   : > { %v452_v33 = vadd.f32 %v444_v43, %v432_v41  ;;  %1065 = vmatpush3.bf16.msra.mxu0 %v1107_v62 }
 0x111   : > { %v1398_v46 = vadd.f32 %v563_v44, %v555_v32  ;;  %v504_v48 = vadd.f32 %v496_v58, %v484_v45  ;;  %1066 = vmatprep.subr.bf16.mxu0 %v1108_v52 }
 0x113   : > { %1061 = vmatprep.mubr.msk.f32.mxu1 %vm332_vm1, %v1398_v46  ;;  %v564_v61 = vadd.f32 %v504_v48, %v452_v33 }
 0x114   : > { %1067 = vmatpush3.bf16.msra.mxu0 %v1108_v52 }
 0x115   : > { %v1404_v47 = vadd.f32 %v564_v61, %v556_v59  ;;  %1068 = vmatprep.subr.bf16.mxu0 %v1109_v4 }
 0x117   : > { %1062 = vmatmul.mubr.msk.f32.gmra.mrb[6].mxu1 %vm332_vm1, %v1404_v47 }
 0x118   : > { %1069 = vmatpush3.bf16.msra.mxu0 %v1109_v4 }
 0x119   : > { %1070 = vmatprep.subr.bf16.mxu0 %v1110_v12 }
 0x11c   : > { %1071 = vmatpush3.bf16.msra.mxu0 %v1110_v12 }
 0x1d2   : > { %v1054_v53 = vpop.f32.mrb[0].mxu1 }
 0x1d3   : > { %v975_v54 = vmul.f32 -1.442695, %v1054_v53  ;;  %v671_v55 = vpop.f32.mrb[1].mxu1 }
 0x1d4   : > { %v974_v56 = vmul.f32 -1.442695, %v671_v55 }
 0x1d5   : > { %1111 = vpow2.f32 %v975_v54 }
 0x1d6   : > { %1113 = vpow2.f32 %v974_v56 }
 0x1d9   : > { %v1057_v57 = vpop.f32.mrb[2].mxu1 }
 0x1da   : > { %v977_v60 = vmul.f32 -1.442695, %v1057_v57  ;;  %v681_v63 = vpop.f32.mrb[3].mxu1 }
 0x1db   : > { %v976_v5 = vmul.f32 -1.442695, %v681_v63 }
 0x1dc   : > { %1115 = vpow2.f32 %v977_v60 }
 0x1dd   : > { %1117 = vpow2.f32 %v976_v5 }
 0x1df   : > { %v1112_v6 = vpop.eup %1111 }
 0x1e0   : > { %v1114_v7 = vpop.eup %1113  ;;  %v735_v8 = vadd.f32 1.0, %v1112_v6 }
 0x1e1   : > { %v734_v9 = vadd.f32 1.0, %v1114_v7 }
 0x1e2   : > { %1119 = vrcp.f32 %v735_v8  ;;  %v1060_v10 = vpop.f32.mrb[4].mxu1 }
 0x1e3   : > { %1121 = vrcp.f32 %v734_v9  ;;  %v979_v13 = vmul.f32 -1.442695, %v1060_v10  ;;  %v691_v14 = vpop.f32.mrb[5].mxu1 }
 0x1e4   : > { %v978_v0 = vmul.f32 -1.442695, %v691_v14 }
 0x1e5   : > { %1123 = vpow2.f32 %v979_v13 }
 0x1e6   : > { %v1116_v17 = vpop.eup %1115  ;;  %1125 = vpow2.f32 %v978_v0 }
 0x1e7   : > { %v1118_v11 = vpop.eup %1117  ;;  %v737_v16 = vadd.f32 1.0, %v1116_v17 }
 0x1e8   : > { %v736_v1 = vadd.f32 1.0, %v1118_v11 }
 0x1e9   : > { %1127 = vrcp.f32 %v737_v16 }
 0x1ea   : > { %1129 = vrcp.f32 %v736_v1  ;;  %v1063_v19 = vpop.f32.mrb[6].mxu1 }
 0x1eb   : > { %v981_v20 = vmul.f32 -1.442695, %v1063_v19  ;;  %v701_v21 = vpop.f32.mrb[7].mxu1 }
 0x1ec   : > { %v1120_v22 = vpop.eup %1119  ;;  %v980_v23 = vmul.f32 -1.442695, %v701_v21 }
 0x1ed   : > { %v1122_v26 = vpop.eup %1121  ;;  %v759_v3 = vmul.f32 %v1120_v22, %v1054_v53  ;;  %1131 = vpow2.f32 %v981_v20 }
 0x1ee   : > { %v758_v28 = vmul.f32 %v1122_v26, %v671_v55  ;;  %1133 = vpow2.f32 %v980_v23 }
 0x1ef   : > { %v1124_v29 = vpop.eup %1123  ;;  %v767_v30 = vmul.f32 %v759_v3, %v1337_v18 }
 0x1f0   : > { %v1126_v24 = vpop.eup %1125  ;;  %v766_v27 = vmul.f32 %v758_v28, %v1333_v15  ;;  %v739_v31 = vadd.f32 1.0, %v1124_v29 }
 0x1f1   : > { %v738_v35 = vadd.f32 1.0, %v1126_v24 }
 0x1f2   : > { %v774_v37 = vpack.c.bf16 %v767_v30, %v766_v27  ;;  %1135 = vrcp.f32 %v739_v31 }
 0x1f3   : > { %v1128_v38 = vpop.eup %1127  ;;  %1137 = vrcp.f32 %v738_v35 }
 0x1f4   : > { %v1130_v39 = vpop.eup %1129  ;;  %v761_v34 = vmul.f32 %v1128_v38, %v1057_v57  ;;  %1072 = vmatprep.mubr.msk.bf16.mxu0 %vm332_vm1, %v774_v37 }
 0x1f5   : > { %v760_v40 = vmul.f32 %v1130_v39, %v681_v63 }
 0x1f6   : > { %v769_v36 = vmul.f32 %v761_v34, %v1364_v51 }
 0x1f7   : > { %v1132_v49 = vpop.eup %1131  ;;  %v768_v50 = vmul.f32 %v760_v40, %v1348_v25 }
 0x1f8   : > { %v1134_v18 = vpop.eup %1133  ;;  %v741_v41 = vadd.f32 1.0, %v1132_v49 }
 0x1f9   : > { %v775_v43 = vpack.c.bf16 %v769_v36, %v768_v50  ;;  %v740_v15 = vadd.f32 1.0, %v1134_v18 }
 0x1fa   : > { %1139 = vrcp.f32 %v741_v41 }
 0x1fb   : > { %1141 = vrcp.f32 %v740_v15  ;;  %1073 = vmatmul.mubr.msk.bf16.vlgmr.msra.gmra.mrb[8].mxu0 %vm332_vm1, %v775_v43 }
 0x1fc   : > { %v1136_v32 = vpop.eup %1135 }
 0x1fd   : > { %v1138_v44 = vpop.eup %1137  ;;  %v763_v45 = vmul.f32 %v1136_v32, %v1060_v10 }
 0x1fe   : > { %v762_v58 = vmul.f32 %v1138_v44, %v691_v14 }
 0x1ff   : > { %v771_v33 = vmul.f32 %v763_v45, %v1390_v42 }
 0x200   : > { %v770_v51 = vmul.f32 %v762_v58, %v1378_v2 }
 0x202   : > { %v776_v48 = vpack.c.bf16 %v771_v33, %v770_v51 }
 0x204   : > { %v1140_v59 = vpop.eup %1139  ;;  %1076 = vmatprep.mubr.msk.bf16.mxu0 %vm332_vm1, %v776_v48 }
 0x205   : > { %v1142_v25 = vpop.eup %1141  ;;  %v765_v61 = vmul.f32 %v1140_v59, %v1063_v19 }
 0x206   : > { %v764_v62 = vmul.f32 %v1142_v25, %v701_v21 }
 0x207   : > { %v773_v52 = vmul.f32 %v765_v61, %v1404_v47 }
 0x208   : > { %v772_v4 = vmul.f32 %v764_v62, %v1398_v46 }
 0x20a   : > { %v777_v12 = vpack.c.bf16 %v773_v52, %v772_v4 }
 0x20c   : > { %1077 = vmatmul.mubr.msk.bf16.gmra.mrb[12].mxu0 %vm332_vm1, %v777_v12 }
 0x2ce   : > { %v1074_v2 = vpop.f32.mrb[8].mxu0 }
 0x2cf   : > { %889 = vst.msk [vmem:[%s224_s11 + $0x10] sm:$0xff] %vm254_vm0, %v1074_v2  ;;  %v856_v42 = vpop.f32.mrb[9].mxu0 }
 0x2d0   : > { %887 = vst.msk [vmem:[%s224_s11] sm:$0xff] %vm254_vm0, %v856_v42  ;;  %v1075_v53 = vpop.f32.mrb[10].mxu0 }
 0x2d1   : > { %890 = vst.msk [vmem:[%s224_s11 + $0x18] sm:$0xff] %vm254_vm0, %v1075_v53  ;;  %v859_v47 = vpop.f32.mrb[11].mxu0 }
 0x2d2   : > { %888 = vst.msk [vmem:[%s224_s11 + $0x8] sm:$0xff] %vm254_vm0, %v859_v47 }
 0x2df   : > { %v1078_v46 = vpop.f32.mrb[12].mxu0 }
 0x2e0   : > { %893 = vst.msk [vmem:[%s224_s11 + $0x30] sm:$0xff] %vm254_vm0, %v1078_v46  ;;  %v872_v54 = vpop.f32.mrb[13].mxu0 }
 0x2e1   : > { %891 = vst.msk [vmem:[%s224_s11 + $0x20] sm:$0xff] %vm254_vm0, %v872_v54  ;;  %v1079_v55 = vpop.f32.mrb[14].mxu0 }
 0x2e2   : > { %894 = vst.msk [vmem:[%s224_s11 + $0x38] sm:$0xff] %vm254_vm0, %v1079_v55  ;;  %v875_v56 = vpop.f32.mrb[15].mxu0 }
 0x2e3   : > { %892 = vst.msk [vmem:[%s224_s11 + $0x28] sm:$0xff] %vm254_vm0, %v875_v56 }
 0x2e4 PF: > { %s15_s18 = sadd.s32 1, %s1149_s18  }
 0x2e5   : > { %p12_p4 = scmp.ge.s32.totalorder %s15_s18, 4  }
 0x2e7   :  { %14 = sbr.rel (!%p12_p4) target bundleno = 1 (0x1), region = 72 }

</bundles_post_ra>
